<compile_context>
chip_gen: v5e
topology: v5e:2x2
jax: 0.10.0
libtpu: 0.0.40
codegen_flags: <defaults>
</compile_context>

<pallas_src>
from typing import Dict, List, Tuple

import jax
import jax.numpy as jnp
from jax.experimental import pallas as pl
from jax.experimental.pallas import tpu as pltpu

EPS = 1e-5  # BatchNorm1d default eps


def _round_up(x: int, m: int) -> int:
    return ((x + m - 1) // m) * m


# --------------------------- fused layer kernel ----------------------------

def hetero_sage_layer(h_stack, adj_stack, invdeg_stack,
                      w_neigh, w_self_sum, b_sum, gamma, beta,
                      etype_tbl, src_tbl, n_etypes, counts, *,
                      n_pad: int, f_pad: int, h_pad: int, max_e: int,
                      proj_w=None, proj_b=None, f_out_pad: int = 0):
    """One HeteroGraphConv(SAGEConv-mean) layer + per-ntype BN + ReLU.

    h_stack:     [T, n_pad, f_pad]    bf16  node features per ntype (padded)
    adj_stack:   [E, n_pad, n_pad]    bf16  binary dense adjacency (dst x src)
    invdeg_stack:[E, n_pad, 1]        f32   1/in-degree per dst row (clamped)
    w_neigh:     [E, f_pad, h_pad]    bf16  W_neigh per etype
    w_self_sum:  [T, f_pad, h_pad]    bf16  sum of W_self over etypes -> dst t
    b_sum:       [T, 1, h_pad]        f32   sum of biases over etypes -> dst t
    gamma/beta:  [T, 1, h_pad]        f32   BN affine per ntype
    etype_tbl:   [T*max_e] int32  CSR: etype ids per dst type (padding repeats)
    src_tbl:     [T*max_e] int32  src ntype of etype_tbl entries
    n_etypes:    [T] int32        number of real etypes per dst type
    counts:      [T] int32        real node count per ntype
    proj_w/b:    optional [T, h_pad, f_out_pad] bf16 / [T, 1, f_out_pad] f32 —
                 if given, the final per-ntype Linear is fused into the epilogue.
    """
    T = h_stack.shape[0]
    fuse_proj = proj_w is not None

    def kernel(etbl_ref, stbl_ref, ne_ref, cnt_ref,          # scalar prefetch
               adj_ref, idg_ref, hsrc_ref, hdst_ref,
               wn_ref, ws_ref, bs_ref, g_ref, be_ref, *rest):
        if fuse_proj:
            pw_ref, pb_ref, out_ref, acc_ref = rest
        else:
            out_ref, acc_ref = rest
        t = pl.program_id(0)
        j = pl.program_id(1)

        # Hoisted self path: init accumulator once per ntype.
        @pl.when(j == 0)
        def _():
            acc_ref[...] = (jnp.dot(hdst_ref[0], ws_ref[0],
                                    preferred_element_type=jnp.float32)
                            + bs_ref[0])

        # Neighbour path only for real (non-padded) etype slots of this dst.
        @pl.when(j < ne_ref[t])
        def _():
            neigh_sum = jnp.dot(adj_ref[0], hsrc_ref[0],
                                preferred_element_type=jnp.float32)
            mean_neigh = (neigh_sum * idg_ref[0]).astype(jnp.bfloat16)
            acc_ref[...] += jnp.dot(mean_neigh, wn_ref[0],
                                    preferred_element_type=jnp.float32)

        # Epilogue: BatchNorm (batch stats over the real rows, single pass)
        # + ReLU (+ optional fused final Linear), then one lane-dense store.
        @pl.when(j == pl.num_programs(1) - 1)
        def _():
            x = acc_ref[...]
            n_real = cnt_ref[t]
            rows = jax.lax.broadcasted_iota(jnp.int32, x.shape, 0)
            mask = (rows < n_real).astype(jnp.float32)
            inv_n = 1.0 / jnp.maximum(n_real, 1).astype(jnp.float32)
            xm = x * mask
            mean = jnp.sum(xm, axis=0, keepdims=True) * inv_n
            ex2 = jnp.sum(xm * xm, axis=0, keepdims=True) * inv_n
            var = jnp.maximum(ex2 - mean * mean, 0.0)   # biased, like PyTorch
            xn = (x - mean) * jax.lax.rsqrt(var + EPS)
            y = jnp.maximum(xn * g_ref[0] + be_ref[0], 0.0) * mask
            if fuse_proj:
                out_ref[0] = (jnp.dot(y.astype(jnp.bfloat16), pw_ref[0],
                                      preferred_element_type=jnp.float32)
                              + pb_ref[0]).astype(out_ref.dtype)
            else:
                out_ref[0] = y.astype(out_ref.dtype)

    in_specs = [
        # binary adjacency of etype etype_tbl[t, j]
        pl.BlockSpec((1, n_pad, n_pad),
                     lambda t, j, et, st, ne, cn: (et[t * max_e + j], 0, 0)),
        # 1/in-degree of the same etype
        pl.BlockSpec((1, n_pad, 1),
                     lambda t, j, et, st, ne, cn: (et[t * max_e + j], 0, 0)),
        # source-type features (data-dependent via scalar prefetch)
        pl.BlockSpec((1, n_pad, f_pad),
                     lambda t, j, et, st, ne, cn: (st[t * max_e + j], 0, 0)),
        # destination-type features (constant across j -> DMA'd once per t)
        pl.BlockSpec((1, n_pad, f_pad),
                     lambda t, j, et, st, ne, cn: (t, 0, 0)),
        # W_neigh of the etype
        pl.BlockSpec((1, f_pad, h_pad),
                     lambda t, j, et, st, ne, cn: (et[t * max_e + j], 0, 0)),
        # pre-summed W_self / bias of the dst type
        pl.BlockSpec((1, f_pad, h_pad),
                     lambda t, j, et, st, ne, cn: (t, 0, 0)),
        pl.BlockSpec((1, 1, h_pad),
                     lambda t, j, et, st, ne, cn: (t, 0, 0)),
        # BN gamma / beta of the dst type
        pl.BlockSpec((1, 1, h_pad),
                     lambda t, j, et, st, ne, cn: (t, 0, 0)),
        pl.BlockSpec((1, 1, h_pad),
                     lambda t, j, et, st, ne, cn: (t, 0, 0)),
    ]
    call_args = [etype_tbl, src_tbl, n_etypes, counts,
                 adj_stack, invdeg_stack, h_stack, h_stack,
                 w_neigh, w_self_sum, b_sum, gamma, beta]

    if fuse_proj:
        in_specs += [
            pl.BlockSpec((1, h_pad, f_out_pad),
                         lambda t, j, et, st, ne, cn: (t, 0, 0)),
            pl.BlockSpec((1, 1, f_out_pad),
                         lambda t, j, et, st, ne, cn: (t, 0, 0)),
        ]
        call_args += [proj_w, proj_b]
        out_shape = jax.ShapeDtypeStruct((T, n_pad, f_out_pad), jnp.float32)
        out_spec = pl.BlockSpec((1, n_pad, f_out_pad),
                                lambda t, j, et, st, ne, cn: (t, 0, 0))
    else:
        out_shape = jax.ShapeDtypeStruct((T, n_pad, h_pad), jnp.bfloat16)
        out_spec = pl.BlockSpec((1, n_pad, h_pad),
                                lambda t, j, et, st, ne, cn: (t, 0, 0))

    return pl.pallas_call(
        kernel,
        out_shape=out_shape,
        grid_spec=pltpu.PrefetchScalarGridSpec(
            num_scalar_prefetch=4,
            grid=(T, max_e),
            in_specs=in_specs,
            out_specs=out_spec,
            scratch_shapes=[pltpu.VMEM((n_pad, h_pad), jnp.float32)],
        ),
        compiler_params=pltpu.CompilerParams(
            dimension_semantics=("parallel", "arbitrary"),
            vmem_limit_bytes=56 * 1024 * 1024),  # safe on v5e/v6e/v7x
    )(*call_args)


# ------------------------------- model glue --------------------------------

def hetero_gnn_forward(params, adj_stack, invdeg_stack, h0_stack,
                       etype_tbl, src_tbl, n_etypes, counts,
                       num_layers: int, n_pad: int, f_pad: int, h_pad: int,
                       max_e: int):
    h = h0_stack
    f_in_pad = f_pad
    for i in range(num_layers):
        lp = params["layers"][i]
        last = (i == num_layers - 1)
        fp = params["final_proj"] if last else None
        h = hetero_sage_layer(
            h, adj_stack, invdeg_stack,
            lp["w_neigh"], lp["w_self_sum"], lp["b_sum"],
            lp["gamma"], lp["beta"],
            etype_tbl, src_tbl, n_etypes, counts,
            n_pad=n_pad, f_pad=f_in_pad, h_pad=h_pad, max_e=max_e,
            proj_w=fp["w"] if last else None,
            proj_b=fp["b"] if last else None,
            f_out_pad=f_pad)
        f_in_pad = h_pad
    return h


def init_packed_params(key, in_feats, hidden, etypes, node_types, dst_of_list,
                       num_layers, f_pad, h_pad):
    """Per-etype SAGE weights with the self path pre-summed per dst ntype,
    zero-padded to lane-dense shapes and stacked over etypes/ntypes."""
    T, E = len(node_types), len(etypes)
    params = {"layers": [], "final_proj": None}
    f_in, f_in_pad = in_feats, f_pad
    for _ in range(num_layers):
        wn = jnp.zeros((E, f_in_pad, h_pad), jnp.float32)
        ws_sum = jnp.zeros((T, f_in_pad, h_pad), jnp.float32)
        b_sum = jnp.zeros((T, 1, h_pad), jnp.float32)
        for ei in range(E):
            key, k1, k2, k3 = jax.random.split(key, 4)
            w_self = 0.1 * jax.random.normal(k1, (f_in, hidden), jnp.float32)
            w_neigh = 0.1 * jax.random.normal(k2, (f_in, hidden), jnp.float32)
            bias = 0.1 * jax.random.normal(k3, (hidden,), jnp.float32)
            td = dst_of_list[ei]
            wn = wn.at[ei, :f_in, :hidden].set(w_neigh)
            ws_sum = ws_sum.at[td, :f_in, :hidden].add(w_self)
            b_sum = b_sum.at[td, 0, :hidden].add(bias)
        gamma = jnp.zeros((T, 1, h_pad), jnp.float32)
        beta = jnp.zeros((T, 1, h_pad), jnp.float32)
        for ti in range(T):
            key, k1, k2 = jax.random.split(key, 3)
            gamma = gamma.at[ti, 0, :hidden].set(
                1.0 + 0.1 * jax.random.normal(k1, (hidden,), jnp.float32))
            beta = beta.at[ti, 0, :hidden].set(
                0.1 * jax.random.normal(k2, (hidden,), jnp.float32))
        params["layers"].append({
            "w_neigh": wn.astype(jnp.bfloat16),
            "w_self_sum": ws_sum.astype(jnp.bfloat16),
            "b_sum": b_sum, "gamma": gamma, "beta": beta})
        f_in, f_in_pad = hidden, h_pad
    wp = jnp.zeros((T, h_pad, f_pad), jnp.float32)
    bp = jnp.zeros((T, 1, f_pad), jnp.float32)
    for ti in range(T):
        key, k1, k2 = jax.random.split(key, 3)
        wp = wp.at[ti, :hidden, :in_feats].set(
            0.1 * jax.random.normal(k1, (hidden, in_feats), jnp.float32))
        bp = bp.at[ti, 0, :in_feats].set(
            0.1 * jax.random.normal(k2, (in_feats,), jnp.float32))
    params["final_proj"] = {"w": wp.astype(jnp.bfloat16), "b": bp}
    return params


def make_adj(key, n_dst, n_src):
    # Binary dense adjacency [N_dst, N_src] (bf16-exact) plus f32 1/in-degree
    # applied post-matmul for SAGE 'mean' aggregation (zero in-degree -> 0).
    mask = jax.random.bernoulli(key, 0.3, (n_dst, n_src)).astype(jnp.float32)
    deg = jnp.sum(mask, axis=1, keepdims=True)
    inv_deg = 1.0 / jnp.maximum(deg, 1.0)
    return mask, inv_deg


if __name__ == "__main__":
    key = jax.random.PRNGKey(0)

    node_types: List[str] = ["user", "item"]
    num_nodes = {"user": 32, "item": 24}
    etypes: List[Tuple[str, str, str]] = [
        ("user", "follows", "user"),
        ("user", "buys", "item"),
        ("item", "bought_by", "user"),
    ]
    in_feats, hidden_feats, num_layers = 16, 32, 2

    T, E = len(node_types), len(etypes)
    t_of = {nt: i for i, nt in enumerate(node_types)}
    N_PAD = _round_up(max(num_nodes.values()), 8)     # sublane-aligned node pad
    F_PAD = _round_up(in_feats, 128)                  # lane-dense feature pad
    H_PAD = _round_up(hidden_feats, 128)              # lane-dense hidden pad

    k_feat, k_adj, k_par = jax.random.split(key, 3)

    # stacked node features [T, N_PAD, F_PAD] (bf16 for the MXU)
    feat_keys = jax.random.split(k_feat, T)
    h0 = jnp.zeros((T, N_PAD, F_PAD), jnp.float32)
    inputs: Dict[str, jnp.ndarray] = {}
    for i, nt in enumerate(node_types):
        x = jax.random.normal(feat_keys[i], (num_nodes[nt], in_feats), jnp.float32)
        inputs[nt] = x
        h0 = h0.at[i, :num_nodes[nt], :in_feats].set(x)
    h0 = h0.astype(jnp.bfloat16)

    # stacked binary adjacency [E, N_PAD, N_PAD] + f32 inverse in-degrees
    adj_keys = jax.random.split(k_adj, E)
    adj_stack = jnp.zeros((E, N_PAD, N_PAD), jnp.float32)
    invdeg_stack = jnp.ones((E, N_PAD, 1), jnp.float32)
    for ei, et in enumerate(etypes):
        src, _, dst = et
        a, idg = make_adj(adj_keys[ei], num_nodes[dst], num_nodes[src])
        adj_stack = adj_stack.at[ei, :num_nodes[dst], :num_nodes[src]].set(a)
        invdeg_stack = invdeg_stack.at[ei, :num_nodes[dst], :1].set(idg)
    adj_stack = adj_stack.astype(jnp.bfloat16)

    # CSR-style scalar-prefetch tables: which etypes feed each dst ntype.
    src_of_list = [t_of[et[0]] for et in etypes]
    dst_of_list = [t_of[et[2]] for et in etypes]
    etype_per_dst = [[] for _ in range(T)]
    for ei in range(E):
        etype_per_dst[dst_of_list[ei]].append(ei)
    # every ntype must receive >=1 etype (DGL drops non-receiving ntypes; this
    # kernel assumes the full-coverage case, which holds for this graph).
    assert all(len(lst) > 0 for lst in etype_per_dst)
    MAX_E = max(len(lst) for lst in etype_per_dst)
    etbl_flat, stbl_flat = [], []
    for t in range(T):
        ids = etype_per_dst[t]
        padded = ids + [ids[-1]] * (MAX_E - len(ids))  # repeat -> DMA elided
        etbl_flat += padded
        stbl_flat += [src_of_list[e] for e in padded]
    etype_tbl = jnp.array(etbl_flat, jnp.int32)
    src_tbl = jnp.array(stbl_flat, jnp.int32)
    n_etypes = jnp.array([len(etype_per_dst[t]) for t in range(T)], jnp.int32)
    counts = jnp.array([num_nodes[nt] for nt in node_types], jnp.int32)

    params = init_packed_params(k_par, in_feats, hidden_feats, etypes,
                                node_types, dst_of_list, num_layers,
                                F_PAD, H_PAD)

    out_stack = hetero_gnn_forward(params, adj_stack, invdeg_stack, h0,
                                   etype_tbl, src_tbl, n_etypes, counts,
                                   num_layers, N_PAD, F_PAD, H_PAD, MAX_E)
    out_stack = jax.block_until_ready(out_stack)

    out = {nt: out_stack[t_of[nt], :num_nodes[nt], :in_feats]
           for nt in node_types}
    for nt in node_types:
        assert out[nt].shape == (num_nodes[nt], in_feats), (nt, out[nt].shape)
        assert out[nt].dtype == jnp.float32
        assert bool(jnp.all(jnp.isfinite(out[nt])))

    print("KERNEL_OK")
</pallas_src>

<mosaic_0001>
module attributes {stable_mosaic.version = 11 : i64} {
  func.func @kernel(%arg0: i32, %arg1: i32, %arg2: memref<4xi32, #tpu.memory_space<smem>>, %arg3: memref<4xi32, #tpu.memory_space<smem>>, %arg4: memref<2xi32, #tpu.memory_space<smem>>, %arg5: memref<2xi32, #tpu.memory_space<smem>>, %arg6: memref<1x32x32xbf16, #tpu.memory_space<vmem>>, %arg7: memref<1x32x1xf32, #tpu.memory_space<vmem>>, %arg8: memref<1x32x128xbf16, #tpu.memory_space<vmem>>, %arg9: memref<1x32x128xbf16, #tpu.memory_space<vmem>>, %arg10: memref<1x128x128xbf16, #tpu.memory_space<vmem>>, %arg11: memref<1x128x128xbf16, #tpu.memory_space<vmem>>, %arg12: memref<1x1x128xf32, #tpu.memory_space<vmem>>, %arg13: memref<1x1x128xf32, #tpu.memory_space<vmem>>, %arg14: memref<1x1x128xf32, #tpu.memory_space<vmem>>, %arg15: memref<1x32x128xbf16, #tpu.memory_space<vmem>>, %arg16: memref<32x128xf32, #tpu.memory_space<vmem>>) attributes {dimension_semantics = [#tpu.dimension_semantics<parallel>, #tpu.dimension_semantics<arbitrary>], iteration_bounds = array<i64: 2, 2>, scalar_prefetch = 4 : i64, scratch_operands = 1 : i64, tpu.core_type = #tpu.core_type<tc>, window_params = [{transform_indices = @transform_0, window_bounds = array<i64: 1, 32, 32>}, {transform_indices = @transform_1, window_bounds = array<i64: 1, 32, 1>}, {transform_indices = @transform_2, window_bounds = array<i64: 1, 32, 128>}, {transform_indices = @transform_3, window_bounds = array<i64: 1, 32, 128>}, {transform_indices = @transform_4, window_bounds = array<i64: 1, 128, 128>}, {transform_indices = @transform_5, window_bounds = array<i64: 1, 128, 128>}, {transform_indices = @transform_6, window_bounds = array<i64: 1, 1, 128>}, {transform_indices = @transform_7, window_bounds = array<i64: 1, 1, 128>}, {transform_indices = @transform_8, window_bounds = array<i64: 1, 1, 128>}, {transform_indices = @transform_9, window_bounds = array<i64: 1, 32, 128>}]} {
    %c0_i32 = arith.constant 0 : i32
    %0 = arith.cmpi eq, %arg1, %c0_i32 : i32
    %1 = arith.extui %0 : i1 to i32
    %c0_i32_0 = arith.constant 0 : i32
    %2 = arith.cmpi ne, %1, %c0_i32_0 : i32
    scf.if %2 {
      %c0 = arith.constant 0 : index
      %c0_3 = arith.constant 0 : index
      %c0_4 = arith.constant 0 : index
      %11 = vector.load %arg9[%c0, %c0_3, %c0_4] : memref<1x32x128xbf16, #tpu.memory_space<vmem>>, vector<1x32x128xbf16>
      %12 = vector.shape_cast %11 : vector<1x32x128xbf16> to vector<32x128xbf16>
      %c0_5 = arith.constant 0 : index
      %c0_6 = arith.constant 0 : index
      %c0_7 = arith.constant 0 : index
      %13 = vector.load %arg11[%c0_5, %c0_6, %c0_7] : memref<1x128x128xbf16, #tpu.memory_space<vmem>>, vector<1x128x128xbf16>
      %14 = vector.shape_cast %13 : vector<1x128x128xbf16> to vector<128x128xbf16>
      %cst = arith.constant dense<0.000000e+00> : vector<32x128xf32>
      %15 = tpu.matmul %12, %14, %cst {dimension_numbers = #tpu.dot_dimension_numbers<[1], [0], [0], [1], [0, 0, 1, 1], [], []>} : vector<32x128xbf16>, vector<128x128xbf16>, vector<32x128xf32> -> vector<32x128xf32>
      %c0_8 = arith.constant 0 : index
      %c0_9 = arith.constant 0 : index
      %c0_10 = arith.constant 0 : index
      %16 = vector.load %arg12[%c0_8, %c0_9, %c0_10] : memref<1x1x128xf32, #tpu.memory_space<vmem>>, vector<1x1x128xf32>
      %17 = vector.shape_cast %16 : vector<1x1x128xf32> to vector<1x128xf32>
      %18 = vector.broadcast %17 : vector<1x128xf32> to vector<32x128xf32>
      %19 = arith.addf %15, %18 : vector<32x128xf32>
      %c0_11 = arith.constant 0 : index
      %c0_12 = arith.constant 0 : index
      %20 = vector.load %arg16[%c0_11, %c0_12] : memref<32x128xf32, #tpu.memory_space<vmem>>, vector<32x128xf32>
      tpu.vector_store %arg16[%c0_11, %c0_12], %19 {strides = array<i32>} : memref<32x128xf32, #tpu.memory_space<vmem>>, vector<32x128xf32>,
    } else {
    }
    %3 = arith.index_cast %arg0 : i32 to index
    %4 = memref.load %arg4[%3] : memref<2xi32, #tpu.memory_space<smem>>
    %5 = arith.cmpi slt, %arg1, %4 : i32
    %6 = arith.extui %5 : i1 to i32
    %c0_i32_1 = arith.constant 0 : i32
    %7 = arith.cmpi ne, %6, %c0_i32_1 : i32
    scf.if %7 {
      %c0 = arith.constant 0 : index
      %c0_3 = arith.constant 0 : index
      %c0_4 = arith.constant 0 : index
      %11 = vector.load %arg6[%c0, %c0_3, %c0_4] : memref<1x32x32xbf16, #tpu.memory_space<vmem>>, vector<1x32x32xbf16>
      %12 = vector.shape_cast %11 : vector<1x32x32xbf16> to vector<32x32xbf16>
      %c0_5 = arith.constant 0 : index
      %c0_6 = arith.constant 0 : index
      %c0_7 = arith.constant 0 : index
      %13 = vector.load %arg8[%c0_5, %c0_6, %c0_7] : memref<1x32x128xbf16, #tpu.memory_space<vmem>>, vector<1x32x128xbf16>
      %14 = vector.shape_cast %13 : vector<1x32x128xbf16> to vector<32x128xbf16>
      %cst = arith.constant dense<0.000000e+00> : vector<32x128xf32>
      %15 = tpu.matmul %12, %14, %cst {dimension_numbers = #tpu.dot_dimension_numbers<[1], [0], [0], [1], [0, 0, 1, 1], [], []>} : vector<32x32xbf16>, vector<32x128xbf16>, vector<32x128xf32> -> vector<32x128xf32>
      %c0_8 = arith.constant 0 : index
      %c0_9 = arith.constant 0 : index
      %c0_10 = arith.constant 0 : index
      %16 = vector.load %arg7[%c0_8, %c0_9, %c0_10] : memref<1x32x1xf32, #tpu.memory_space<vmem>>, vector<1x32x1xf32>
      %17 = vector.shape_cast %16 : vector<1x32x1xf32> to vector<32x1xf32>
      %18 = vector.broadcast %17 : vector<32x1xf32> to vector<32x128xf32>
      %19 = arith.mulf %15, %18 : vector<32x128xf32>
      %20 = arith.truncf %19 : vector<32x128xf32> to vector<32x128xbf16>
      %c0_11 = arith.constant 0 : index
      %c0_12 = arith.constant 0 : index
      %21 = vector.load %arg16[%c0_11, %c0_12] : memref<32x128xf32, #tpu.memory_space<vmem>>, vector<32x128xf32>
      %c0_13 = arith.constant 0 : index
      %c0_14 = arith.constant 0 : index
      %c0_15 = arith.constant 0 : index
      %22 = vector.load %arg10[%c0_13, %c0_14, %c0_15] : memref<1x128x128xbf16, #tpu.memory_space<vmem>>, vector<1x128x128xbf16>
      %23 = vector.shape_cast %22 : vector<1x128x128xbf16> to vector<128x128xbf16>
      %cst_16 = arith.constant dense<0.000000e+00> : vector<32x128xf32>
      %24 = tpu.matmul %20, %23, %cst_16 {dimension_numbers = #tpu.dot_dimension_numbers<[1], [0], [0], [1], [0, 0, 1, 1], [], []>} : vector<32x128xbf16>, vector<128x128xbf16>, vector<32x128xf32> -> vector<32x128xf32>
      %25 = arith.addf %21, %24 : vector<32x128xf32>
      %c0_17 = arith.constant 0 : index
      %c0_18 = arith.constant 0 : index
      %26 = vector.load %arg16[%c0_17, %c0_18] : memref<32x128xf32, #tpu.memory_space<vmem>>, vector<32x128xf32>
      tpu.vector_store %arg16[%c0_17, %c0_18], %25 {strides = array<i32>} : memref<32x128xf32, #tpu.memory_space<vmem>>, vector<32x128xf32>,
    } else {
    }
    %c1_i32 = arith.constant 1 : i32
    %8 = arith.cmpi eq, %arg1, %c1_i32 : i32
    %9 = arith.extui %8 : i1 to i32
    %c0_i32_2 = arith.constant 0 : i32
    %10 = arith.cmpi ne, %9, %c0_i32_2 : i32
    scf.if %10 {
      %c0 = arith.constant 0 : index
      %c0_3 = arith.constant 0 : index
      %11 = vector.load %arg16[%c0, %c0_3] : memref<32x128xf32, #tpu.memory_space<vmem>>, vector<32x128xf32>
      %12 = arith.index_cast %arg0 : i32 to index
      %13 = memref.load %arg5[%12] : memref<2xi32, #tpu.memory_space<smem>>
      %14 = tpu.iota {dimensions = array<i32: 0>} : vector<32x128xi32>
      %15 = vector.broadcast %13 : i32 to vector<32x128xi32>
      %16 = arith.cmpi slt, %14, %15 : vector<32x128xi32>
      %17 = arith.extui %16 : vector<32x128xi1> to vector<32x128xi32>
      %18 = arith.sitofp %17 : vector<32x128xi32> to vector<32x128xf32>
      %c1_i32_4 = arith.constant 1 : i32
      %19 = arith.maxsi %13, %c1_i32_4 : i32
      %20 = arith.sitofp %19 : i32 to f32
      %cst = arith.constant 1.000000e+00 : f32
      %21 = arith.divf %cst, %20 : f32
      %22 = arith.mulf %11, %18 : vector<32x128xf32>
      %cst_5 = arith.constant dense<0.000000e+00> : vector<128xf32>
      %23 = vector.multi_reduction <add>, %22, %cst_5 [0] : vector<32x128xf32> to vector<128xf32>
      %24 = vector.shape_cast %23 : vector<128xf32> to vector<1x128xf32>
      %25 = vector.broadcast %21 : f32 to vector<1x128xf32>
      %26 = arith.mulf %24, %25 : vector<1x128xf32>
      %27 = arith.mulf %22, %22 : vector<32x128xf32>
      %cst_6 = arith.constant dense<0.000000e+00> : vector<128xf32>
      %28 = vector.multi_reduction <add>, %27, %cst_6 [0] : vector<32x128xf32> to vector<128xf32>
      %29 = vector.shape_cast %28 : vector<128xf32> to vector<1x128xf32>
      %30 = vector.broadcast %21 : f32 to vector<1x128xf32>
      %31 = arith.mulf %29, %30 : vector<1x128xf32>
      %32 = arith.mulf %26, %26 : vector<1x128xf32>
      %33 = arith.subf %31, %32 : vector<1x128xf32>
      %cst_7 = arith.constant 0.000000e+00 : f32
      %34 = vector.broadcast %cst_7 : f32 to vector<1x128xf32>
      %35 = arith.maximumf %33, %34 : vector<1x128xf32>
      %36 = vector.broadcast %26 : vector<1x128xf32> to vector<32x128xf32>
      %37 = arith.subf %11, %36 : vector<32x128xf32>
      %cst_8 = arith.constant 9.99999974E-6 : f32
      %38 = vector.broadcast %cst_8 : f32 to vector<1x128xf32>
      %39 = arith.addf %35, %38 : vector<1x128xf32>
      %40 = math.rsqrt %39 : vector<1x128xf32>
      %41 = vector.broadcast %40 : vector<1x128xf32> to vector<32x128xf32>
      %42 = arith.mulf %37, %41 : vector<32x128xf32>
      %c0_9 = arith.constant 0 : index
      %c0_10 = arith.constant 0 : index
      %c0_11 = arith.constant 0 : index
      %43 = vector.load %arg13[%c0_9, %c0_10, %c0_11] : memref<1x1x128xf32, #tpu.memory_space<vmem>>, vector<1x1x128xf32>
      %44 = vector.shape_cast %43 : vector<1x1x128xf32> to vector<1x128xf32>
      %45 = vector.broadcast %44 : vector<1x128xf32> to vector<32x128xf32>
      %46 = arith.mulf %42, %45 : vector<32x128xf32>
      %c0_12 = arith.constant 0 : index
      %c0_13 = arith.constant 0 : index
      %c0_14 = arith.constant 0 : index
      %47 = vector.load %arg14[%c0_12, %c0_13, %c0_14] : memref<1x1x128xf32, #tpu.memory_space<vmem>>, vector<1x1x128xf32>
      %48 = vector.shape_cast %47 : vector<1x1x128xf32> to vector<1x128xf32>
      %49 = vector.broadcast %48 : vector<1x128xf32> to vector<32x128xf32>
      %50 = arith.addf %46, %49 : vector<32x128xf32>
      %cst_15 = arith.constant 0.000000e+00 : f32
      %51 = vector.broadcast %cst_15 : f32 to vector<32x128xf32>
      %52 = arith.maximumf %50, %51 : vector<32x128xf32>
      %53 = arith.mulf %52, %18 : vector<32x128xf32>
      %54 = arith.truncf %53 : vector<32x128xf32> to vector<32x128xbf16>
      %c0_16 = arith.constant 0 : index
      %c0_17 = arith.constant 0 : index
      %c0_18 = arith.constant 0 : index
      %55 = vector.load %arg15[%c0_16, %c0_17, %c0_18] : memref<1x32x128xbf16, #tpu.memory_space<vmem>>, vector<1x32x128xbf16>
      %56 = vector.shape_cast %55 : vector<1x32x128xbf16> to vector<32x128xbf16>
      %57 = vector.shape_cast %54 : vector<32x128xbf16> to vector<1x32x128xbf16>
      tpu.vector_store %arg15[%c0_16, %c0_17, %c0_18], %57 {strides = array<i32>} : memref<1x32x128xbf16, #tpu.memory_space<vmem>>, vector<1x32x128xbf16>,
    } else {
    }
    return
  }
  func.func @transform_0(%arg0: i32, %arg1: i32, %arg2: memref<4xi32, #tpu.memory_space<smem>>, %arg3: memref<4xi32, #tpu.memory_space<smem>>, %arg4: memref<2xi32, #tpu.memory_space<smem>>, %arg5: memref<2xi32, #tpu.memory_space<smem>>) -> (i32, i32, i32) {
    %c2_i32 = arith.constant 2 : i32
    %0 = arith.muli %arg0, %c2_i32 : i32
    %1 = arith.addi %0, %arg1 : i32
    %2 = arith.index_cast %1 : i32 to index
    %3 = memref.load %arg2[%2] : memref<4xi32, #tpu.memory_space<smem>>
    %c0_i32 = arith.constant 0 : i32
    %c0_i32_0 = arith.constant 0 : i32
    %c0_i32_1 = arith.constant 0 : i32
    return %3, %c0_i32, %c0_i32_0 : i32, i32, i32
  }
  func.func @transform_1(%arg0: i32, %arg1: i32, %arg2: memref<4xi32, #tpu.memory_space<smem>>, %arg3: memref<4xi32, #tpu.memory_space<smem>>, %arg4: memref<2xi32, #tpu.memory_space<smem>>, %arg5: memref<2xi32, #tpu.memory_space<smem>>) -> (i32, i32, i32) {
    %c2_i32 = arith.constant 2 : i32
    %0 = arith.muli %arg0, %c2_i32 : i32
    %1 = arith.addi %0, %arg1 : i32
    %2 = arith.index_cast %1 : i32 to index
    %3 = memref.load %arg2[%2] : memref<4xi32, #tpu.memory_space<smem>>
    %c0_i32 = arith.constant 0 : i32
    %c0_i32_0 = arith.constant 0 : i32
    %c0_i32_1 = arith.constant 0 : i32
    return %3, %c0_i32, %c0_i32_0 : i32, i32, i32
  }
  func.func @transform_2(%arg0: i32, %arg1: i32, %arg2: memref<4xi32, #tpu.memory_space<smem>>, %arg3: memref<4xi32, #tpu.memory_space<smem>>, %arg4: memref<2xi32, #tpu.memory_space<smem>>, %arg5: memref<2xi32, #tpu.memory_space<smem>>) -> (i32, i32, i32) {
    %c2_i32 = arith.constant 2 : i32
    %0 = arith.muli %arg0, %c2_i32 : i32
    %1 = arith.addi %0, %arg1 : i32
    %2 = arith.index_cast %1 : i32 to index
    %3 = memref.load %arg3[%2] : memref<4xi32, #tpu.memory_space<smem>>
    %c0_i32 = arith.constant 0 : i32
    %c0_i32_0 = arith.constant 0 : i32
    %c0_i32_1 = arith.constant 0 : i32
    return %3, %c0_i32, %c0_i32_0 : i32, i32, i32
  }
  func.func @transform_3(%arg0: i32, %arg1: i32, %arg2: memref<4xi32, #tpu.memory_space<smem>>, %arg3: memref<4xi32, #tpu.memory_space<smem>>, %arg4: memref<2xi32, #tpu.memory_space<smem>>, %arg5: memref<2xi32, #tpu.memory_space<smem>>) -> (i32, i32, i32) {
    %c0_i32 = arith.constant 0 : i32
    %c0_i32_0 = arith.constant 0 : i32
    %c0_i32_1 = arith.constant 0 : i32
    return %arg0, %c0_i32, %c0_i32_0 : i32, i32, i32
  }
  func.func @transform_4(%arg0: i32, %arg1: i32, %arg2: memref<4xi32, #tpu.memory_space<smem>>, %arg3: memref<4xi32, #tpu.memory_space<smem>>, %arg4: memref<2xi32, #tpu.memory_space<smem>>, %arg5: memref<2xi32, #tpu.memory_space<smem>>) -> (i32, i32, i32) {
    %c2_i32 = arith.constant 2 : i32
    %0 = arith.muli %arg0, %c2_i32 : i32
    %1 = arith.addi %0, %arg1 : i32
    %2 = arith.index_cast %1 : i32 to index
    %3 = memref.load %arg2[%2] : memref<4xi32, #tpu.memory_space<smem>>
    %c0_i32 = arith.constant 0 : i32
    %c0_i32_0 = arith.constant 0 : i32
    %c0_i32_1 = arith.constant 0 : i32
    return %3, %c0_i32, %c0_i32_0 : i32, i32, i32
  }
  func.func @transform_5(%arg0: i32, %arg1: i32, %arg2: memref<4xi32, #tpu.memory_space<smem>>, %arg3: memref<4xi32, #tpu.memory_space<smem>>, %arg4: memref<2xi32, #tpu.memory_space<smem>>, %arg5: memref<2xi32, #tpu.memory_space<smem>>) -> (i32, i32, i32) {
    %c0_i32 = arith.constant 0 : i32
    %c0_i32_0 = arith.constant 0 : i32
    %c0_i32_1 = arith.constant 0 : i32
    return %arg0, %c0_i32, %c0_i32_0 : i32, i32, i32
  }
  func.func @transform_6(%arg0: i32, %arg1: i32, %arg2: memref<4xi32, #tpu.memory_space<smem>>, %arg3: memref<4xi32, #tpu.memory_space<smem>>, %arg4: memref<2xi32, #tpu.memory_space<smem>>, %arg5: memref<2xi32, #tpu.memory_space<smem>>) -> (i32, i32, i32) {
    %c0_i32 = arith.constant 0 : i32
    %c0_i32_0 = arith.constant 0 : i32
    %c0_i32_1 = arith.constant 0 : i32
    return %arg0, %c0_i32, %c0_i32_0 : i32, i32, i32
  }
  func.func @transform_7(%arg0: i32, %arg1: i32, %arg2: memref<4xi32, #tpu.memory_space<smem>>, %arg3: memref<4xi32, #tpu.memory_space<smem>>, %arg4: memref<2xi32, #tpu.memory_space<smem>>, %arg5: memref<2xi32, #tpu.memory_space<smem>>) -> (i32, i32, i32) {
    %c0_i32 = arith.constant 0 : i32
    %c0_i32_0 = arith.constant 0 : i32
    %c0_i32_1 = arith.constant 0 : i32
    return %arg0, %c0_i32, %c0_i32_0 : i32, i32, i32
  }
  func.func @transform_8(%arg0: i32, %arg1: i32, %arg2: memref<4xi32, #tpu.memory_space<smem>>, %arg3: memref<4xi32, #tpu.memory_space<smem>>, %arg4: memref<2xi32, #tpu.memory_space<smem>>, %arg5: memref<2xi32, #tpu.memory_space<smem>>) -> (i32, i32, i32) {
    %c0_i32 = arith.constant 0 : i32
    %c0_i32_0 = arith.constant 0 : i32
    %c0_i32_1 = arith.constant 0 : i32
    return %arg0, %c0_i32, %c0_i32_0 : i32, i32, i32
  }
  func.func @transform_9(%arg0: i32, %arg1: i32, %arg2: memref<4xi32, #tpu.memory_space<smem>>, %arg3: memref<4xi32, #tpu.memory_space<smem>>, %arg4: memref<2xi32, #tpu.memory_space<smem>>, %arg5: memref<2xi32, #tpu.memory_space<smem>>) -> (i32, i32, i32) {
    %c0_i32 = arith.constant 0 : i32
    %c0_i32_0 = arith.constant 0 : i32
    %c0_i32_1 = arith.constant 0 : i32
    return %arg0, %c0_i32, %c0_i32_0 : i32, i32, i32
  }
}

</mosaic_0001>

<bundles_post_ra>
// kernel: tpu_custom_call.1
= control target key start
LH: loop header
LB: loop body
LE: loop exit
PB: predicated region body
PF: predicated region fallthrough
CT: control target
= control target key end

     0   :  { %s1886_s14 = smov [#allocation4]   ;;  %s1887_s15 = smov [#allocation5]   ;;  %s2370_s0 = inlined_call_operand.vmem [shape: s32[4], index: 0, kind: input, shape index: {}]   ;;  %s2371_s4 = inlined_call_operand.vmem [shape: bf16[3,32,32], index: 4, kind: input, shape index: {}]   ;;  %s2372_s5 = inlined_call_operand.vmem [shape: f32[3,32,1], index: 5, kind: input, shape index: {}]   ;;  %s2373_s6 = inlined_call_operand.vmem [shape: bf16[2,32,128], index: 6, kind: input, shape index: {}]   ;;  %s2374_s7 = inlined_call_operand.hbm [shape: bf16[2,32,128], index: 7, kind: input, shape index: {}]   ;;  %s2375_s8 = inlined_call_operand.hbm [shape: bf16[3,128,128], index: 8, kind: input, shape index: {}]   ;;  %s2376_s9 = inlined_call_operand.hbm [shape: bf16[2,128,128], index: 9, kind: input, shape index: {}]   ;;  %s2377_s10 = inlined_call_operand.vmem [shape: f32[2,1,128], index: 10, kind: input, shape index: {}]   ;;  %s2378_s11 = inlined_call_operand.vmem [shape: f32[2,1,128], index: 11, kind: input, shape index: {}]   ;;  %s2379_s12 = inlined_call_operand.vmem [shape: f32[2,1,128], index: 12, kind: input, shape index: {}]   ;;  %s2380_s13 = inlined_call_operand.hbm [shape: bf16[2,32,128], index: 13, kind: output, shape index: {}]   ;;  %s2381_s1 = inlined_call_operand.vmem [shape: s32[4], index: 1, kind: input, shape index: {}]   ;;  %s2382_s2 = inlined_call_operand.vmem [shape: s32[2], index: 2, kind: input, shape index: {}]   ;;  %s2383_s3 = inlined_call_operand.vmem [shape: s32[2], index: 3, kind: input, shape index: {}]  }
   0x1   :  { %2401 = sst [smem:[#allocation32_spill]] %s2371_s4  ;;  %s19_s27 = sshll.u32 %s2370_s0, 4  ;;  %s20_s27 = int_to_ptr.vmem [resolvable:$true] %s19_s27 }
   0x2   :  { %2402 = sst [smem:[#allocation33_spill]] %s2372_s5  ;;  %s24_s30 = sshll.u32 %s2381_s1, 4  ;;  %s25_s30 = int_to_ptr.vmem [resolvable:$true] %s24_s30 }
   0x3   :  { %2403 = sst [smem:[#allocation34_spill]] %s2373_s6  ;;  %s29_s18 = sshll.u32 %s2382_s2, 4  ;;  %s30_s18 = int_to_ptr.vmem [resolvable:$true] %s29_s18 }
   0x4   :  { %2404 = sst [smem:[#allocation35_spill]] %s2374_s7  ;;  %s34_s21 = sshll.u32 %s2383_s3, 4  ;;  %s35_s21 = int_to_ptr.vmem [resolvable:$true] %s34_s21 }
   0x5   :  { %2405 = sst [smem:[#allocation36_spill]] %s2375_s8  ;;  %s1888_s0 = smov [#allocation6]  }
   0x6   :  { %2406 = sst [smem:[#allocation37_spill]] %s2376_s9  ;;  %s1889_s22 = smov [#allocation7]  }
   0x7   :  { %2407 = sst [smem:[#allocation38_spill]] %s2378_s11 }
   0x8   :  { %2408 = sst [smem:[#allocation39_spill]] %s2379_s12 }
   0x9   :  { %2409 = sst [smem:[#allocation40_spill]] %s2380_s13 }
   0xa   :  { %22 = dma.vmem_to_smem %s20_s27, 16, %s1886_s14, [#allocation3] }
   0xb   :  { %27 = dma.vmem_to_smem %s25_s30, 16, %s1887_s15, [#allocation3] }
   0xc   :  { %32 = dma.vmem_to_smem %s30_s18, 16, %s1888_s0, [#allocation3] }
   0xd   :  { %37 = dma.vmem_to_smem %s35_s21, 16, %s1889_s22, [#allocation3] }
   0xe   :  { %1824 = dma.done.wait [#allocation3], 64 }
   0xf   :  { %1825 = vsyncadd [#allocation3], 4294967232 }
  0x10   :  { %40 = sfence }
  0x11   :  { %41 = vsyncpa [#allocation9], 0 }
  0x12   :  { %43 = vsyncpa [#allocation9 + $0x1], 0 }
  0x13   :  { %44 = vsyncpa [#allocation12], 0 }
  0x14   :  { %46 = vsyncpa [#allocation12 + $0x1], 0 }
  0x15   :  { %47 = vsyncpa [#allocation10], 0 }
  0x16   :  { %49 = vsyncpa [#allocation10 + $0x1], 0  ;;  %s1978_s1 = smov 0   ;;  %s1980_s2 = smov 0  }
  0x17   :  { %s1982_s23 = smov 0   ;;  %s1984_s3 = smov 0  }
  0x18   :  { %s1986_s24 = smov 0   ;;  %s1988_s25 = smov 0  }
  0x19   :  { %s1990_s26 = smov 0   ;;  %s1992_s27 = smov 0  }
  0x1a   :  { %s1994_s28 = smov 0   ;;  %s1996_s29 = smov 0  }
  0x1b   :  { %s1998_s30 = smov 0  }
  0x1c LB: > { %2410 = sst [smem:[#allocation22_spill]] %s1852_s23  ;;  %s2034_s14 = sadd.s32 4294967295, %s1884_s30   ;;  %s1884_s30 = sphi %s1998_s30, %s55_s30   ;;  %s1880_s29 = sphi %s1996_s29, %s2465_s29   ;;  %s1876_s28 = sphi %s1994_s28, %s2458_s28   ;;  %s1872_s27 = sphi %s1992_s27, %s2464_s27   ;;  %s1868_s26 = sphi %s1990_s26, %s2457_s26   ;;  %s1864_s25 = sphi %s1988_s25, %s2456_s25   ;;  %s1860_s24 = sphi %s1986_s24, %s2463_s24   ;;  %s1856_s3 = sphi %s1984_s3, %s2462_s3   ;;  %s1852_s23 = sphi %s1982_s23, %s2454_s23   ;;  %s1848_s2 = sphi %s1980_s2, %s2461_s2   ;;  %s1844_s1 = sphi %s1978_s1, %s2460_s1  }
  0x1d   : > { %2411 = sst [smem:[#allocation23_spill]] %s1856_s3  ;;  %s64_s15 = sadd.s32 1, %s1876_s28 }
  0x1e   : > { %2412 = sst [smem:[#allocation24_spill]] %s1864_s25  ;;  %p65_p0 = scmp.ge.s32.totalorder %s64_s15, 2 }
  0x1f   : > { %2413 = sst [smem:[#allocation25_spill]] %s1876_s28  ;;  %s67_s16 = sadd.s32 1, %s1880_s29 }
  0x20   : > { %p178_p1 = scmp.eq.s32.totalorder %s1884_s30, 0  ;;  %p184_p2 = scmp.eq.s32.totalorder %s2034_s14, 0 }
  0x21   : > { %s2467_s15 = smov (%p65_p0, %s64_s15), 0  ;;  %s2469_s16 = smov (!%p65_p0, %s67_s16), %s1880_s29 }
  0x22   : > { %2414 = sst [smem:[#allocation26_spill]] %s2467_s15  ;;  %s1291_s17 = sshll.u32 %s1880_s29, 1 }
  0x23   : > { %s202_s18 = sadd.s32 1, %s1852_s23  ;;  %p69_p3 = scmp.ge.s32.totalorder %s2469_s16, 2 }
  0x24   : > { %s194_s19 = sadd.s32 %s1876_s28, %s1291_s17  ;;  %p209_p4 = scmp.ne.s32.totalorder %s1852_s23, %s1848_s2 }
  0x25   : > { %s195_s20 = sld [smem:[#allocation4 + %s194_s19]]  ;;  %s2471_s16 = smov (%p69_p3, %s2469_s16), 0 }
  0x26   : > { %2415 = sst [smem:[#allocation27_spill]] %s2471_s16  ;;  %p2052_p5 = por %p209_p4, %p178_p1 }
  0x27   : > { %p215_p6 = scmp.ne.s32.totalorder %s1848_s2, %s1844_s1  ;;  %s1292_s0 = sshll.u32 %s2471_s16, 1 }
  0x28   : > { %s197_s22 = sadd.s32 %s1292_s0, %s2467_s15  ;;  %p2389_p8 = scmp.lt.s32.totalorder %s1884_s30, 4 }
  0x29   : > { %p2062_p7 = por %p215_p6, %p184_p2  ;;  %s198_s28 = sld [smem:[#allocation4 + %s197_s22]] }
  0x2a   : > { %s433_s13 = sand.u32 1, %s1884_s30   ;;  %s435_s6 = sand.u32 1, %s1852_s23  }
  0x2b   : > { %s1298_s5 = sshll.u32 %s435_s6, 6  ;;  %p2073_p9 = pnand %p2389_p8, %p2052_p5 }
  0x2c   : > { %s1480_s0 = scalar_select %p2052_p5, [#allocation4], [#allocation15] }
  0x2d   : > { %s437_s4 = scalar_lea.vmem [#allocation11], %s1298_s5  ;;  %s2473_s19 = smov (!%p2052_p5, %s194_s19), 0 }
  0x2e   : > { %s2079_s22 = sshll.u32 %s437_s4, 4  ;;  %s2475_s0 = smov (!%p2389_p8, %s1480_s0), [#allocation16] }
  0x2f   : > { %s199_s15 = ssub.s32 %s195_s20, %s198_s28  ;;  %2419 = sst [smem:[#allocation28_spill]] %s2079_s22 }
  0x30   : > { %p200_p10 = scmp.eq.s32.totalorder %s199_s15, 0  ;;  %s2477_s19 = smov (!%p2389_p8, %s2473_s19), 0 }
  0x31   : > { %p1305_p11 = scmp.ge.s32.totalorder %s1884_s30, 1  ;;  %s440_s12 = sld [smem:[%s2475_s0 + %s2477_s19]] }
  0x32   : > { %s2085_s6 = scalar_select %p200_p10, %s1852_s23, %s202_s18  }
  0x33   : > { %p496_p12 = scmp.lt.s32.totalorder %s1884_s30, 5  ;;  %s2422_s8 = sld [smem:[#allocation36_spill]] }
  0x34   : > { %2420 = sst [smem:[#allocation29_spill]] %s2085_s6  ;;  %s1284_s21 = sadd.s32 4294967294, %s1884_s30  }
  0x35   : > { %p2093_p13 = pnand %p1305_p11, %p496_p12  ;;  %s167_s22 = ssub.s32 %s1880_s29, %s2471_s16 }
  0x36   : > { %p2103_p0 = scmp.eq.s32.totalorder %s167_s22, 0  ;;  %s2107_s23 = scalar_lea.sflag [#allocation12], %s433_s13 }
  0x37   : > { %s1422_s4 = sshll.u32 %s440_s12, 6  ;;  %p1666_p4 = pneg %p2073_p9 }
  0x39   : > { %s445_s20 = scalar_lea.hbm %s2422_s8, %s1422_s4  ;;  %s1669_s28 = scalar_lea.hbm %s2422_s8, 192 }
  0x3a   : > { %s446_s18 = sshll.u32 %s445_s20, 4  ;;  %s447_s18 = int_to_ptr.hbm [resolvable:$true] %s446_s18 }
  0x3b   : > { %s1662_s19 = sshra.s32 %s447_s18, 4  ;;  %s1663_s19 = int_to_ptr.hbm [resolvable:$true] %s1662_s19 }
  0x3c   : > { %s1664_s0 = scalar_lea.hbm %s1663_s19, 64  ;;  %p1670_p10 = scmp.lt.s32.totalorder %s1663_s19, %s2422_s8 }
  0x3d   : > { %p1665_p3 = scmp.ne.s32.totalorder %s1663_s19, %s1664_s0  ;;  %p1671_p11 = scmp.lt.s32.totalorder %s1669_s28, %s1664_s0 }
  0x3f   : > { %p1667_p5 = pnand %p1666_p4, %p1665_p3  ;;  %p1672_p12 = por %p1671_p11, %p1670_p10 }
  0x41   : > { %p1668_p6 = pneg %p1667_p5 }
  0x43   : > { %p1673_p8 = pnand %p1672_p12, %p1668_p6 }
  0x45   : > { %1676 = shalt.err (!%p1673_p8)
}
  0x46   : > { %s2390_s13 = smov 64   ;;  %s2424_s22 = sld [smem:[#allocation28_spill]] }
  0x47   : > { %s2392_s19 = smov 4   ;;  %s170_s12 = sadd.s32 1, %s1864_s25 }
  0x48   : > { %p177_p8 = scmp.ne.s32.totalorder %s1864_s25, %s1860_s24  ;;  %p183_p4 = scmp.ne.s32.totalorder %s1860_s24, %s1856_s3 }
  0x49   : > { %s2131_s4 = scalar_select %p2103_p0, %s1864_s25, %s170_s12  }
  0x4a   : > { %p2135_p3 = por %p178_p1, %p177_p8  ;;  %p343_p5 = scmp.eq.s32.totalorder %s2034_s14, 3 }
  0x4b   : > { %2426 = sst [smem:[#allocation30_spill]] %s2131_s4  ;;  %p349_p6 = scmp.eq.s32.totalorder %s1284_s21, 3 }
  0x4c   : > { %s2425_s0 = int_to_ptr.vmem [resolvable:$true] %s2424_s22  ;;  %p2144_p10 = por %p184_p2, %p183_p4 }
  0x4d   : > { %1497 = dma.hbm_to_vmem [thread:$0]  (!%p2073_p9), %s447_s18, 1024, %s2425_s0, %s2107_s23, %s2390_s13, %s2390_s13, %s2392_s19  }
  0x4e   : > { %s411_s18 = sand.u32 1, %s1864_s25   ;;  %p2149_p9 = por %p343_p5, %p177_p8 }
  0x4f   : > { %p2153_p1 = por %p349_p6, %p183_p4  ;;  %s1295_s20 = sshll.u32 %s411_s18, 4 }
  0x50   : > { %s2429_s6 = scalar_select %p2149_p9, 1, 0 }
  0x51   : > { %s2431_s15 = scalar_select %p2153_p1, 1, 0 }
  0x52   : > { %2430 = sst [smem:[#allocation28_spill]] %s2429_s6  ;;  %s1421_s22 = sshll.u32 %s1880_s29, 4 }
  0x53   : > { %2432 = sst [smem:[#allocation31_spill]] %s2431_s15  ;;  %s415_s13 = scalar_lea.vmem [#allocation8], %s1295_s20 }
  0x54   : > { %s2433_s7 = sld [smem:[#allocation35_spill]]  ;;  %s423_s19 = sshll.u32 %s415_s13, 4  ;;  %s424_s19 = int_to_ptr.vmem [resolvable:$true] %s423_s19 }
  0x55   : > { %p2434_p2 = scmp.lt.s32.totalorder %s1884_s30, 4  ;;  %s1302_s16 = sshll.u32 %s411_s18, 6 }
  0x56   : > { %s1423_s4 = sshll.u32 %s1880_s29, 6  ;;  %s412_s25 = scalar_lea.sflag [#allocation9], %s411_s18 }
  0x57   : > { %p1490_p0 = pnand %p2434_p2, %p2135_p3  ;;  %s2435_s3 = smov 4  }
  0x58   : > { %s2436_s15 = smov 64   ;;  %s2437_s9 = sld [smem:[#allocation37_spill]] }
  0x59   : > { %s462_s20 = scalar_lea.vmem [#allocation13], %s1302_s16  ;;  %s2179_s28 = sand.u32 (!%p2093_p13), 1, %s1860_s24  }
  0x5a   : > { %s420_s21 = scalar_lea.hbm %s2433_s7, %s1421_s22  ;;  %s470_s0 = sshll.u32 %s462_s20, 4  ;;  %s471_s0 = int_to_ptr.vmem [resolvable:$true] %s470_s0 }
  0x5b   : > { %s421_s8 = sshll.u32 %s420_s21, 4  ;;  %s503_s11 = scalar_lea.sflag (!%p2093_p13), [#allocation9], %s2179_s28  ;;  %s422_s8 = int_to_ptr.hbm [resolvable:$true] %s421_s8 }
  0x5c   : > { %1492 = dma.hbm_to_vmem [thread:$0]  (!%p1490_p0), %s422_s8, 256, %s424_s19, %s412_s25, %s2436_s15, %s2436_s15, %s2435_s3  }
  0x5d   : > { %500 = sbr.rel (%p2093_p13) target bundleno = 761 (0x2f9), region = 56  ;;  %s2400_s8 = sshll.u32 (!%p2093_p13), %s2179_s28, 4 }
  0x5e   : > { %s467_s22 = scalar_lea.hbm %s2437_s9, %s1423_s4  ;;  %s2185_s25 = scalar_lea.vmem (!%p2093_p13), [#allocation8], %s2400_s8 }
  0x5f   : > { %s468_s13 = sshll.u32 %s467_s22, 4  ;;  %s469_s13 = int_to_ptr.hbm [resolvable:$true] %s468_s13 }
  0x60   : > { %1500 = dma.hbm_to_vmem [thread:$0]  (!%p1490_p0), %s469_s13, 1024, %s471_s0, %s2107_s23, %s2436_s15, %s2436_s15, %s2435_s3  }
  0x62   : > { %1827 = dma.done.wait (%p2144_p10), %s503_s11, 256  }
  0x63   : > { %1829 = vsyncadd (%p2144_p10), %s503_s11, 4294967040  ;;  %s512_s23 = sand.u32 1, %s2034_s14   ;;  %s514_s3 = sand.u32 1, %s1848_s2  }
  0x64   : > { %s1307_s16 = sshll.u32 %s514_s3, 6  ;;  %s513_s5 = scalar_lea.sflag [#allocation12], %s512_s23 }
  0x65   : > { %s2193_s19 = scalar_lea.vmem [#allocation11], %s1307_s16 }
  0x66   : > { %1831 = dma.done.wait (%p2062_p7), %s513_s5, 1024  }
  0x67   : > { %1833 = vsyncadd (%p2062_p7), %s513_s5, 4294966272  ;;  %s1308_s4 = sshll.u32 %s2179_s28, 6 }
  0x68   : > { %s2200_s18 = scalar_lea.vmem [#allocation13], %s1308_s4 }
  0x69   : > { %1835 = dma.done.wait (%p2144_p10), %s513_s5, 1024  }
  0x6a   : > { %1837 = vsyncadd (%p2144_p10), %s513_s5, 4294966272  ;;  %s1310_s14 = sshll.u32 %s1872_s27, 1  ;;  %p641_p13 = scmp.lt.s32.totalorder %s1872_s27, 1 }
  0x6b   : > { %s606_s6 = sadd.s32 %s1868_s26, %s1310_s14  ;;  %s2440_s20 = sld [smem:[#allocation32_spill]] }
  0x6c   : > { %s607_s15 = sld [smem:[#allocation4 + %s606_s6]]  ;;  %p1319_p8 = scmp.ne.s32.totalorder %s1868_s26, 0 }
  0x6d   : > { %s618_s17 = sld [smem:[#allocation4 + %s606_s6]] }
  0x6e   : > { %s629_s12 = sld [smem:[#allocation5 + %s606_s6]] }
  0x6f   : > { %s2210_s21 = scalar_select %p641_p13, %s1872_s27, 1 }
  0x70   : > { %s2441_s0 = sld [smem:[#allocation33_spill]] }
  0x71   : > { %s2442_s5 = sld [smem:[#allocation34_spill]] }
  0x72   : > { %p608_p7 = scmp.lt.s32.totalorder %s607_s15, 2 }
  0x73   : > { %p619_p11 = scmp.lt.s32.totalorder %s618_s17, 2 }
  0x74   : > { %s2479_s15 = smov (!%p608_p7, %s607_s15), 2  ;;  %p630_p12 = scmp.lt.s32.totalorder %s629_s12, 1 }
  0x75   : > { %s2481_s17 = smov (!%p619_p11, %s618_s17), 2  ;;  %s1424_s14 = sshll.u32 %s2479_s15, 4 }
  0x76   : > { %s2227_s8 = scalar_lea.vmem %s2440_s20, %s1424_s14  ;;  %s1425_s1 = sshll.u32 %s2481_s17, 5 }
  0x77   : > { %s2232_s13 = scalar_lea.vmem %s2441_s0, %s1425_s1  ;;  %s2483_s12 = smov (!%p630_p12, %s629_s12), 1 }
  0x78   : > { %s1426_s11 = sshll.u32 %s2483_s12, 4  ;;  %s2443_s15 = sshll.u32 %s2179_s28, 4 }
  0x79   : > { %s2237_s4 = scalar_lea.vmem %s2442_s5, %s1426_s11  ;;  %s2241_s23 = scalar_lea.vmem [#allocation14], %s2443_s15 }
  0x7a   : > { %654 = sbr.rel (%p1319_p8) target bundleno = 297 (0x129), region = 72  ;;  %s2444_s17 = scalar_lea.vmem (!%p1319_p8), %s2377_s10, %s2210_s21 }
  0x7f   : > { %v1436_v0 = vld [vmem:[%s2200_s18 + $0x38] sm:$0xff]  ;;  %v1435_v1 = vld [vmem:[%s2200_s18 + $0x30] sm:$0xff]  ;;  %v1434_v2 = vld [vmem:[%s2200_s18 + $0x28] sm:$0xff] }
  0x80   : > { %739 = vmatpush.bf16.msra.mxu0 %v1436_v0  ;;  %1461 = vmatpush.bf16.msra.mxu1 %v1436_v0  ;;  %v1433_v3 = vld [vmem:[%s2200_s18 + $0x20] sm:$0xff]  ;;  %v1432_v4 = vld [vmem:[%s2200_s18 + $0x18] sm:$0xff]  ;;  %v1431_v5 = vld [vmem:[%s2200_s18 + $0x10] sm:$0xff] }
  0x81   : > { %v1430_v6 = vld [vmem:[%s2200_s18 + $0x8] sm:$0xff]  ;;  %v1429_v7 = vld [vmem:[%s2200_s18] sm:$0xff] }
  0x82   : > { %v1427_v8 = vld [vmem:[%s2185_s25] sm:$0xff]  ;;  %v1428_v9 = vld [vmem:[%s2185_s25 + $0x8] sm:$0xff] }
  0x83   : > { %v1605_v10 = vld [vmem:[%s2444_s17] ss:$0 sm:$0xff] }
  0x84   : > { %740 = vmatpush.bf16.msra.mxu0 %v1435_v1  ;;  %1462 = vmatpush.bf16.msra.mxu1 %v1435_v1 }
  0x88   : > { %741 = vmatpush.bf16.msra.mxu0 %v1434_v2  ;;  %1463 = vmatpush.bf16.msra.mxu1 %v1434_v2 }
  0x8c   : > { %742 = vmatpush.bf16.msra.mxu0 %v1433_v3  ;;  %1464 = vmatpush.bf16.msra.mxu1 %v1433_v3 }
  0x90   : > { %743 = vmatpush.bf16.msra.mxu0 %v1432_v4  ;;  %1465 = vmatpush.bf16.msra.mxu1 %v1432_v4 }
  0x94   : > { %744 = vmatpush.bf16.msra.mxu0 %v1431_v5  ;;  %1466 = vmatpush.bf16.msra.mxu1 %v1431_v5 }
  0x98   : > { %745 = vmatpush.bf16.msra.mxu0 %v1430_v6  ;;  %1467 = vmatpush.bf16.msra.mxu1 %v1430_v6 }
  0x9c   : > { %746 = vmatpush.bf16.msra.mxu0 %v1429_v7  ;;  %1468 = vmatpush.bf16.msra.mxu1 %v1429_v7 }
  0x9f   : > { %747 = vmatmul.bf16.vlgmr.msra.gmra.mxu0 %v1427_v8  ;;  %752 = vmatmul.bf16.vlgmr.msra.gmra.mxu1 %v1428_v9 }
 0x11c   : > { %v748_v11 = vpop.f32.mrf.mxu0  ;;  %v753_v12 = vpop.f32.mrf.mxu1 }
 0x11d   : > { %v749_v13 = vadd.f32 %v1605_v10, %v748_v11  ;;  %v754_v14 = vadd.f32 %v1605_v10, %v753_v12 }
 0x11f   : > { %758 = vst [vmem:[#allocation2 + $0x10] sm:$0xff] %v749_v13 }
 0x120   : > { %760 = vst [vmem:[#allocation2 + $0x18] sm:$0xff] %v754_v14 }
 0x124   : > { %v750_v15 = vpop.f32.mrf.mxu0  ;;  %v755_v16 = vpop.f32.mrf.mxu1 }
 0x125   : > { %v751_v17 = vadd.f32 %v1605_v10, %v750_v15  ;;  %v756_v18 = vadd.f32 %v1605_v10, %v755_v16 }
 0x127   : > { %759 = vst [vmem:[#allocation2] sm:$0xff] %v751_v17 }
 0x128   : > { %761 = vst [vmem:[#allocation2 + $0x8] sm:$0xff] %v756_v18 }
 0x129 PF: > { %s762_s25 = sld [smem:[#allocation6 + %s1872_s27]] }
 0x12f   : > { %p1360_p3 = scmp.ge.s32.totalorder %s1868_s26, %s762_s25 }
 0x131   : > { %766 = sbr.rel (%p1360_p3) target bundleno = 616 (0x268), region = 76 }
 0x136   : > { %v1440_v19 = vld [vmem:[%s2237_s4 + $0x8] sm:$0xff]  ;;  %v1892_v20 = vmov 0   ;;  %v823_v21 = vld [vmem:[%s2232_s13] sm:$0xff]  ;;  %v825_v22 = vld [vmem:[%s2232_s13 + $0x10] sm:$0xff]  ;;  %vm797_vm0 = vcmask 261120  }
 0x137   : > { %1607 = vset.pattern.permute.xlu1 %v1892_v20  ;;  %1606 = vset.pattern.permute.xlu0 %v1892_v20  ;;  %v1439_v23 = vld [vmem:[%s2237_s4] sm:$0xff]  ;;  %v1448_v24 = vld [vmem:[%s2193_s19 + $0x38] sm:$0xff]  ;;  %v1447_v25 = vld [vmem:[%s2193_s19 + $0x30] sm:$0xff] }
 0x138   : > { %810 = vmatpush.bf16.msra.mxu0 %v1440_v19  ;;  %829 = vperm.xlu1 %1607, %v823_v21   ;;  %v1437_v26 = vld [vmem:[%s2227_s8] sm:$0xff]  ;;  %v824_v27 = vld [vmem:[%s2232_s13 + $0x8] sm:$0xff]  ;;  %v826_v28 = vld [vmem:[%s2232_s13 + $0x18] sm:$0xff] }
 0x139   : > { %839 = vperm.xlu0 %1606, %v825_v22   ;;  %921 = vmatpush.bf16.msra.mxu1 %v1448_v24  ;;  %v1446_v29 = vld [vmem:[%s2193_s19 + $0x28] sm:$0xff]  ;;  %v1445_v30 = vld [vmem:[%s2193_s19 + $0x20] sm:$0xff]  ;;  %v1444_v31 = vld [vmem:[%s2193_s19 + $0x18] sm:$0xff] }
 0x13a   : > { %1469 = vmatpush.bf16.msra.mxu2 %v1448_v24  ;;  %v1438_v32 = vld [vmem:[%s2227_s8 + $0x8] sm:$0xff]  ;;  %v1443_v33 = vld [vmem:[%s2193_s19 + $0x10] sm:$0xff]  ;;  %v1441_v35 = vld [vmem:[%s2193_s19] sm:$0xff] }
 0x13b   : > { %v1442_v34 = vld [vmem:[%s2193_s19 + $0x8] sm:$0xff]  ;;  %v853_v50 = vld [vmem:[#allocation2 + $0x10] sm:$0xff]  ;;  %v854_v53 = vld [vmem:[#allocation2] sm:$0xff] }
 0x13c   : > { %811 = vmatpush.bf16.msra.mxu0 %v1439_v23  ;;  %v855_v56 = vld [vmem:[#allocation2 + $0x18] sm:$0xff]  ;;  %v856_v59 = vld [vmem:[#allocation2 + $0x8] sm:$0xff] }
 0x13d   : > { %922 = vmatpush.bf16.msra.mxu1 %v1447_v25 }
 0x13e   : > { %1470 = vmatpush.bf16.msra.mxu2 %v1447_v25 }
 0x13f   : > { %1377 = vmatmul.msk.bf16.vlgmr.msra.gmra.mxu0 %vm797_vm0, %v1437_v26 }
 0x140   : > { %834 = vperm.xlu1 %1607, %v824_v27  }
 0x141   : > { %844 = vperm.xlu0 %1606, %v826_v28   ;;  %923 = vmatpush.bf16.msra.mxu1 %v1446_v29 }
 0x142   : > { %1471 = vmatpush.bf16.msra.mxu2 %v1446_v29 }
 0x145   : > { %924 = vmatpush.bf16.msra.mxu1 %v1445_v30 }
 0x146   : > { %1472 = vmatpush.bf16.msra.mxu2 %v1445_v30 }
 0x149   : > { %925 = vmatpush.bf16.msra.mxu1 %v1444_v31 }
 0x14a   : > { %1473 = vmatpush.bf16.msra.mxu2 %v1444_v31 }
 0x14d   : > { %926 = vmatpush.bf16.msra.mxu1 %v1443_v33 }
 0x14e   : > { %1474 = vmatpush.bf16.msra.mxu2 %v1443_v33 }
 0x14f   : > { %1378 = vmatmul.msk.bf16.gmra.mxu0 %vm797_vm0, %v1438_v32 }
 0x151   : > { %927 = vmatpush.bf16.msra.mxu1 %v1442_v34 }
 0x152   : > { %1475 = vmatpush.bf16.msra.mxu2 %v1442_v34 }
 0x155   : > { %928 = vmatpush.bf16.msra.mxu1 %v1441_v35 }
 0x156   : > { %1476 = vmatpush.bf16.msra.mxu2 %v1441_v35 }
 0x1aa   : > { %v830_v36 = vpop.permute.xlu1 %829 }
 0x1ab   : > { %v840_v43 = vpop.permute.xlu0 %839 }
 0x1b2   : > { %v835_v38 = vpop.permute.xlu1 %834 }
 0x1b3   : > { %v845_v45 = vpop.permute.xlu0 %844 }
 0x1bc   : > { %v813_v37 = vpop.f32.mrf.mxu0 }
 0x1bd   : > { %v847_v40 = vmul.f32 %v830_v36, %v813_v37 }
 0x1c4   : > { %v815_v39 = vpop.f32.mrf.mxu0 }
 0x1c5   : > { %v848_v41 = vmul.f32 %v835_v38, %v815_v39 }
 0x1c7   : > { %v851_v42 = vpack.c.bf16 %v848_v41, %v847_v40 }
 0x1c9   : > { %929 = vmatmul.bf16.vlgmr.msra.gmra.mxu1 %v851_v42 }
 0x1cc   : > { %v818_v44 = vpop.f32.mrf.mxu0 }
 0x1cd   : > { %v849_v47 = vmul.f32 %v840_v43, %v818_v44 }
 0x1d4   : > { %v820_v46 = vpop.f32.mrf.mxu0 }
 0x1d5   : > { %v850_v48 = vmul.f32 %v845_v45, %v820_v46 }
 0x1d7   : > { %v852_v49 = vpack.c.bf16 %v850_v48, %v849_v47 }
 0x1d9   : > { %934 = vmatmul.bf16.vlgmr.msra.gmra.mxu2 %v852_v49 }
 0x246   : > { %v930_v51 = vpop.f32.mrf.mxu1 }
 0x247   : > { %v940_v52 = vadd.f32 %v930_v51, %v853_v50 }
 0x249   : > { %944 = vst [vmem:[#allocation2 + $0x10] sm:$0xff] %v940_v52 }
 0x24e   : > { %v932_v54 = vpop.f32.mrf.mxu1 }
 0x24f   : > { %v941_v55 = vadd.f32 %v932_v54, %v854_v53 }
 0x251   : > { %945 = vst [vmem:[#allocation2] sm:$0xff] %v941_v55 }
 0x25c   : > { %v935_v57 = vpop.f32.mrf.mxu2 }
 0x25d   : > { %v942_v58 = vadd.f32 %v935_v57, %v855_v56 }
 0x25f   : > { %946 = vst [vmem:[#allocation2 + $0x18] sm:$0xff] %v942_v58 }
 0x264   : > { %v937_v60 = vpop.f32.mrf.mxu2 }
 0x265   : > { %v943_v61 = vadd.f32 %v937_v60, %v856_v59 }
 0x267   : > { %947 = vst [vmem:[#allocation2 + $0x8] sm:$0xff] %v943_v61 }
 0x268 PF: > { %p1411_p4 = scmp.ne.s32.totalorder %s1868_s26, 1 }
 0x269   : > { %s956_s8 = sld [smem:[#allocation7 + %s1872_s27]] (!%p1411_p4) }
 0x26a   : > { %951 = sbr.rel (%p1411_p4) target bundleno = 740 (0x2e4), region = 80  ;;  %s2445_s4 = sld [smem:[#allocation38_spill]] (!%p1411_p4) }
 0x26b   : > { %s2447_s20 = sld [smem:[#allocation39_spill]] (!%p1411_p4) }
 0x26f   : > { %p975_p5 = scmp.gt.s32.totalorder %s956_s8, 1  ;;  %v957_v2 = vlaneseq  ;;  %v962_v12 = vstv %s956_s8  ;;  %v2281_v14 = vld [vmem:[#allocation2 + $0x10] sm:$0xff]  ;;  %v2283_v15 = vld [vmem:[#allocation2] sm:$0xff]  ;;  %v1893_v16 = vmov 0.0   ;;  %v954_v22 = vld [vmem:[#allocation2 + $0x18] sm:$0xff] }
 0x270   : > { %v955_v27 = vld [vmem:[#allocation2 + $0x8] sm:$0xff]  ;;  %s2446_s14 = scalar_lea.vmem %s2445_s4, %s2210_s21 }
 0x271   : > { %s976_s19 = scalar_select %p975_p5, %s956_s8, 1  ;;  %v958_v7 = vshrl.u32 %v957_v2, 7 }
 0x272   : > { %s2448_s0 = scalar_lea.vmem %s2447_s20, %s2210_s21 }
 0x273   : > { %s977_s18 = scvt.s32.f32 %s976_s19  ;;  %v959_v11 = vadd.s32 8, %v958_v7  ;;  %v960_v13 = vadd.s32 16, %v958_v7  ;;  %vm963_vm5 = vcmp.lt.s32.totalorder %v958_v7, %v962_v12  ;;  %v961_v19 = vadd.s32 24, %v958_v7 }
 0x274   : > { %v2285_v17 = vsel %vm963_vm5, 1.0, %v1893_v16 }
 0x275   : > { %v978_v62 = vstv %s977_s18  ;;  %vm964_vm6 = vcmp.lt.s32.totalorder %v959_v11, %v962_v12  ;;  %vm965_vm7 = vcmp.lt.s32.totalorder %v960_v13, %v962_v12  ;;  %v994_v20 = vmul.f32 %v2285_v17, %v2281_v14 }
 0x276   : > { %1610 = vrcp.f32 %v978_v62  ;;  %v990_v1 = vand.u32 2147483648, %v978_v62  ;;  %vm984_vm1 = vweird.f32 %v978_v62  ;;  %v988_v4 = vand.u32 2147483647, %v978_v62 }
 0x277   : > { %v2287_v18 = vsel %vm964_vm6, 1.0, %v1893_v16  ;;  %v2293_v23 = vsel %vm965_vm7, 1.0, %v1893_v16  ;;  %vm966_vm8 = vcmp.lt.s32.totalorder %v961_v19, %v962_v12  ;;  %v1009_v25 = vmul.f32 %v994_v20, %v994_v20 }
 0x278   : > { %v991_v6 = vor.u32 1.1754944e-38, %v990_v1  ;;  %vm989_vm4 = vcmp.eq.f32.partialorder %v988_v4, 8.507059e+37  ;;  %v995_v21 = vmul.f32 %v2287_v18, %v2283_v15  ;;  %v996_v24 = vmul.f32 %v2293_v23, %v954_v22 }
 0x279   : > { %v2296_v28 = vsel %vm966_vm8, 1.0, %v1893_v16 }
 0x27a   : > { %v1010_v26 = vmul.f32 %v995_v21, %v995_v21  ;;  %v998_v29 = vadd.f32 %v995_v21, %v994_v20  ;;  %v997_v30 = vmul.f32 %v2296_v28, %v955_v27  ;;  %v1011_v31 = vmul.f32 %v996_v24, %v996_v24 }
 0x27c   : > { %v1611_v63 = vpop.eup %1610  ;;  %v1013_v32 = vadd.f32 %v1010_v26, %v1009_v25  ;;  %v999_v33 = vadd.f32 %v998_v29, %v996_v24  ;;  %v1012_v34 = vmul.f32 %v997_v30, %v997_v30 }
 0x27d   : > { %v980_v0 = vmul.f32 %v1611_v63, %v978_v62  ;;  %vm985_vm2 = vweird.f32 %v1611_v63 }
 0x27e   : > { %vm986_vm3 = vmor %vm984_vm1, %vm985_vm2  ;;  %v1014_v35 = vadd.f32 %v1013_v32, %v1011_v31  ;;  %v1000_v36 = vadd.f32 %v999_v33, %v997_v30 }
 0x27f   : > { %v981_v3 = vsub.f32 1.0, %v980_v0 }
 0x280   : > { %v1015_v37 = vadd.f32 %v1014_v35, %v1012_v34  ;;  %v1001_v38 = vrot.slane %v1000_v36, 4 }
 0x281   : > { %v982_v5 = vmul.f32 %v1611_v63, %v981_v3  ;;  %v1608_v3 = vld [vmem:[%s2446_s14] ss:$0 sm:$0xff] }
 0x282   : > { %v1016_v39 = vrot.slane %v1015_v37, 4  ;;  %v1002_v40 = vadd.f32 %v1001_v38, %v1000_v36 }
 0x283   : > { %v983_v8 = vadd.f32 %v1611_v63, %v982_v5 }
 0x284   : > { %v1017_v41 = vadd.f32 %v1016_v39, %v1015_v37  ;;  %v1003_v42 = vrot.slane %v1002_v40, 2 }
 0x285   : > { %v987_v9 = vsel %vm986_vm3, %v1611_v63, %v983_v8 }
 0x286   : > { %v992_v10 = vsel %vm989_vm4, %v991_v6, %v987_v9  ;;  %v1018_v43 = vrot.slane %v1017_v41, 2  ;;  %v1004_v44 = vadd.f32 %v1003_v42, %v1002_v40  ;;  %v1609_v9 = vld [vmem:[%s2448_s0] ss:$0 sm:$0xff] }
 0x287   : > { %1477 = vpush %v992_v10 }
 0x288   : > { %v1019_v45 = vadd.f32 %v1018_v43, %v1017_v41  ;;  %v1005_v46 = vrot.slane %v1004_v44, 1 }
 0x28a   : > { %v1020_v47 = vrot.slane %v1019_v45, 1  ;;  %v1006_v48 = vadd.f32 %v1005_v46, %v1004_v44 }
 0x28c   : > { %v1021_v49 = vadd.f32 %v1020_v47, %v1019_v45 }
 0x2b8   : > { %s1478_s26 = spop %1477 }
 0x2b9   : > { %v1007_v50 = vstv %s1478_s26 }
 0x2ba   : > { %v1008_v51 = vmul.f32 %v1007_v50, %v1006_v48  ;;  %v1022_v52 = vmul.f32 %v1021_v49, %v1007_v50 }
 0x2bc   : > { %v1023_v53 = vmul.f32 %v1008_v51, %v1008_v51  ;;  %v1026_v63 = vsub.f32 %v2281_v14, %v1008_v51  ;;  %v1027_v0 = vsub.f32 %v2283_v15, %v1008_v51  ;;  %v1028_v1 = vsub.f32 %v954_v22, %v1008_v51 }
 0x2bd   : > { %v1029_v2 = vsub.f32 %v955_v27, %v1008_v51 }
 0x2be   : > { %v1024_v54 = vsub.f32 %v1022_v52, %v1023_v53 }
 0x2c0   : > { %v1025_v55 = vmax.f32 %v1024_v54, 0.0 }
 0x2c2   : > { %v1030_v56 = vadd.f32 1e-05, %v1025_v55 }
 0x2c4   : > { %1612 = vrsqrt.f32 %v1030_v56  ;;  %vm1037_vm10 = vweird.f32 %v1030_v56 }
 0x2ca   : > { %v1613_v57 = vpop.eup %1612 }
 0x2cb   : > { %v1032_v58 = vmul.f32 %v1613_v57, %v1030_v56  ;;  %vm1038_vm9 = vweird.f32 %v1613_v57 }
 0x2cc   : > { %vm1039_vm11 = vmor %vm1037_vm10, %vm1038_vm9 }
 0x2cd   : > { %v1033_v59 = vmul.f32 %v1613_v57, %v1032_v58 }
 0x2cf   : > { %v1034_v60 = vmul.f32 0.5, %v1033_v59 }
 0x2d1   : > { %v1035_v61 = vsub.f32 1.5, %v1034_v60 }
 0x2d3   : > { %v1036_v62 = vmul.f32 %v1613_v57, %v1035_v61 }
 0x2d5   : > { %v1040_v4 = vsel %vm1039_vm11, %v1613_v57, %v1036_v62 }
 0x2d6   : > { %v1041_v5 = vmul.f32 %v1040_v4, %v1026_v63  ;;  %v1042_v6 = vmul.f32 %v1040_v4, %v1027_v0  ;;  %v1043_v7 = vmul.f32 %v1040_v4, %v1028_v1  ;;  %v1044_v8 = vmul.f32 %v1040_v4, %v1029_v2 }
 0x2d8   : > { %v1049_v10 = vmul.f32 %v1608_v3, %v1041_v5  ;;  %v1050_v11 = vmul.f32 %v1608_v3, %v1042_v6  ;;  %v1051_v12 = vmul.f32 %v1608_v3, %v1043_v7  ;;  %v1052_v13 = vmul.f32 %v1608_v3, %v1044_v8 }
 0x2da   : > { %v1057_v14 = vadd.f32 %v1609_v9, %v1049_v10  ;;  %v1058_v15 = vadd.f32 %v1609_v9, %v1050_v11  ;;  %v1059_v16 = vadd.f32 %v1609_v9, %v1051_v12  ;;  %v1060_v19 = vadd.f32 %v1609_v9, %v1052_v13 }
 0x2dc   : > { %v1061_v20 = vmax.f32 %v1057_v14, 0.0  ;;  %v1062_v21 = vmax.f32 %v1058_v15, 0.0  ;;  %v1063_v22 = vmax.f32 %v1059_v16, 0.0  ;;  %v1064_v24 = vmax.f32 %v1060_v19, 0.0 }
 0x2de   : > { %v1065_v25 = vmul.f32 %v2285_v17, %v1061_v20  ;;  %v1066_v26 = vmul.f32 %v2287_v18, %v1062_v21  ;;  %v1067_v27 = vmul.f32 %v2293_v23, %v1063_v22  ;;  %v1068_v29 = vmul.f32 %v2296_v28, %v1064_v24 }
 0x2e0   : > { %v1453_v30 = vpack.c.bf16 %v1066_v26, %v1065_v25  ;;  %v1458_v31 = vpack.c.bf16 %v1068_v29, %v1067_v27 }
 0x2e2   : > { %1454 = vst [vmem:[%s2241_s23] sm:$0xff] %v1453_v30  }
 0x2e3   : > { %1460 = vst [vmem:[%s2241_s23 + $0x8] sm:$0xff] %v1458_v31  }
 0x2e4 PF: > { %s1449_s13 = sshll.u32 %s1872_s27, 4  ;;  %s2450_s16 = sld [smem:[#allocation40_spill]] }
 0x2e5   : > { %s1090_s15 = sshll.u32 %s2241_s23, 4  ;;  %s1078_s9 = scalar_lea.sflag [#allocation10], %s2179_s28  ;;  %s1091_s15 = int_to_ptr.vmem [resolvable:$true] %s1090_s15 }
 0x2ea   : > { %s1089_s5 = scalar_lea.hbm %s2450_s16, %s1449_s13  ;;  %s1772_s27 = scalar_lea.hbm %s2450_s16, 32 }
 0x2eb   : > { %s1092_s7 = sshll.u32 %s1089_s5, 4  ;;  %s1093_s7 = int_to_ptr.hbm [resolvable:$true] %s1092_s7 }
 0x2ec   : > { %s1766_s17 = sshra.s32 %s1093_s7, 4  ;;  %s1767_s17 = int_to_ptr.hbm [resolvable:$true] %s1766_s17 }
 0x2ed   : > { %s1768_s25 = scalar_lea.hbm %s1767_s17, 16  ;;  %p1773_p0 = scmp.lt.s32.totalorder %s1767_s17, %s2450_s16 }
 0x2ee   : > { %p1769_p6 = scmp.ne.s32.totalorder %s1767_s17, %s1768_s25  ;;  %p1774_p13 = scmp.lt.s32.totalorder %s1772_s27, %s1768_s25 }
 0x2f0   : > { %p1770_p10 = pnand %p1769_p6, %p2149_p9  ;;  %p1775_p7 = por %p1774_p13, %p1773_p0 }
 0x2f2   : > { %p1771_p2 = pneg %p1770_p10 }
 0x2f4   : > { %p1776_p11 = pnand %p1775_p7, %p1771_p2 }
 0x2f6   : > { %1779 = shalt.err (!%p1776_p11)
}
 0x2f7   : > { %s1894_s28 = smov 64   ;;  %s1895_s23 = smov 4  }
 0x2f8   : > { %1487 = dma.vmem_to_hbm [thread:$0]  (%p2149_p9), %s1091_s15, 256, %s1093_s7, %s1078_s9, %s1894_s28, %s1894_s28, %s1895_s23  }
 0x2f9 PF: > { %s2451_s12 = sld [smem:[#allocation23_spill]]  ;;  %p1506_p12 = scmp.ge.s32.totalorder %s1884_s30, 2 }
 0x2fb   : > { %p1502_p8 = pnand %p1506_p12, %p2153_p1 }
 0x2fd   : > { %p1503_p3 = pneg %p1502_p8 }
 0x2ff   : > { %s1107_s4 = sand.u32 1, %s2451_s12  }
 0x300   : > { %s1108_s14 = scalar_lea.sflag [#allocation10], %s1107_s4 }
 0x301   : > { %1839 = dma.done.wait (%p1503_p3), %s1108_s14, 256  }
 0x302   : > { %1841 = vsyncadd (%p1503_p3), %s1108_s14, 4294967040  ;;  %s55_s30 = sadd.s32 1, %s1884_s30   ;;  %s2453_s6 = sld [smem:[#allocation22_spill]] }
 0x303   : > { %p52_p4 = scmp.ge.s32.totalorder %s55_s30, 6   ;;  %s2454_s23 = sld [smem:[#allocation29_spill]] }
 0x304   : > { %s2455_s22 = sld [smem:[#allocation24_spill]]  ;;  %s2460_s1 = smov %s1848_s2 }
 0x305   : > { %s2456_s25 = sld [smem:[#allocation30_spill]]  ;;  %s2462_s3 = smov %s1860_s24 }
 0x306   : > { %s2457_s26 = sld [smem:[#allocation25_spill]]  ;;  %s2464_s27 = smov %s1880_s29 }
 0x307   : > { %s2458_s28 = sld [smem:[#allocation26_spill]] }
 0x308   : > { %s2459_s20 = sld [smem:[#allocation27_spill]]  ;;  %s2461_s2 = smov %s2453_s6 }
 0x30a   : > { %s2463_s24 = smov %s2455_s22  ;;  %54 = sbr.rel (!%p52_p4) target bundleno = 28 (0x1c), region = 155 }
 0x30e   : > { %s2465_s29 = smov %s2459_s20 }
 0x30f   :  { %1114 = vsyncpa [#allocation9], 1 }
 0x310   :  { %1116 = vsyncpa [#allocation9 + $0x1], 1 }
 0x311   :  { %1117 = vsyncpa [#allocation12], 1 }
 0x312   :  { %1119 = vsyncpa [#allocation12 + $0x1], 1 }
 0x313   :  { %1120 = vsyncpa [#allocation10], 1 }
 0x314   :  { %1122 = vsyncpa [#allocation10 + $0x1], 1 }

</bundles_post_ra>
